<compile_context>
chip_gen: v7x
topology: tpu7x:2x2x1
jax: 0.10.0
libtpu: 0.0.40
codegen_flags: <defaults>
</compile_context>

<pallas_src>
import functools

import jax
import jax.numpy as jnp
from jax import lax
from jax.experimental import pallas as pl
from jax.experimental.pallas import tpu as pltpu

D_IN, H1, H2, H3, D_OUT = 16, 128, 64, 32, 16


def _mlp_kernel(x_ref, w1_ref, b1_ref, w2_ref, b2_ref, w3_ref, b3_ref,
                w4_ref, b4_ref, o_ref, *, tile_b, chunk_b):
    mxu_dtype = w1_ref.dtype  # bf16 by default, f32 if requested

    def run_chunk(x):
        # Matmuls in the MXU dtype with f32 accumulation; elementwise
        # bias-add / ReLU in f32 (dropout == identity in eval mode).
        h = jnp.dot(x.astype(mxu_dtype), w1_ref[...],
                    preferred_element_type=jnp.float32) + b1_ref[...]
        h = jnp.maximum(h, 0.0)
        h = jnp.dot(h.astype(mxu_dtype), w2_ref[...],
                    preferred_element_type=jnp.float32) + b2_ref[...]
        h = jnp.maximum(h, 0.0)
        h = jnp.dot(h.astype(mxu_dtype), w3_ref[...],
                    preferred_element_type=jnp.float32) + b3_ref[...]
        h = jnp.maximum(h, 0.0)
        y = jnp.dot(h.astype(mxu_dtype), w4_ref[...],
                    preferred_element_type=jnp.float32) + b4_ref[...]
        return y.astype(o_ref.dtype)

    if tile_b <= chunk_b:
        # Single chunk: whole tile fits comfortably in vregs.
        o_ref[...] = run_chunk(x_ref[...])
    else:
        # Big DMA tile, bounded compute working set: walk the tile in
        # chunk_b-row chunks (tile_b is guaranteed a multiple of chunk_b).
        n_chunks = tile_b // chunk_b

        def body(c, carry):
            start = pl.multiple_of(c * chunk_b, chunk_b)
            sl = pl.ds(start, chunk_b)
            o_ref[sl, :] = run_chunk(x_ref[sl, :])
            return carry

        lax.fori_loop(0, n_chunks, body, 0, unroll=True)


def _choose_tile(batch, block_b, chunk_b):
    """Pick a batch tile: big (amortize per-step overhead), sublane-aligned,
    either <= chunk_b or a multiple of it, and giving >=2 grid steps when the
    batch allows (v7x has 2 TensorCores sharding the 'parallel' axis)."""
    tb = min(block_b, batch)
    if tb > chunk_b:
        tb = (tb // chunk_b) * chunk_b          # keep inner loop simple
    if pl.cdiv(batch, tb) < 2 and batch >= 16:
        half = -(-batch // 2)                   # ceil(B/2)
        half = -(-half // 8) * 8                # sublane multiple
        if half > chunk_b:
            half = -(-half // chunk_b) * chunk_b
        if half < batch:
            tb = half
    return tb


# TODO(synk): training-mode dropout (stochastic masking with the pltpu PRNG)
# is not implemented; this kernel reproduces eval-mode forward semantics.
@functools.partial(jax.jit, static_argnames=("block_b", "chunk_b", "mxu_dtype"))
def action_forward(x, params, block_b=2048, chunk_b=128,
                   mxu_dtype=jnp.bfloat16):
    """x: [B, 16] float32 -> [B, 16] float32."""
    w1, b1, w2, b2, w3, b3, w4, b4 = params
    B = x.shape[0]
    tb = _choose_tile(B, block_b, chunk_b)
    grid = (pl.cdiv(B, tb),)

    # Weights in the MXU dtype (halves weight DMA + vreg pressure); biases f32.
    w1, w2, w3, w4 = (w.astype(mxu_dtype) for w in (w1, w2, w3, w4))

    def full(shape):
        # Weights/biases are tiny: whole array resident, same block every step
        # (constant index_map -> DMA'd once, reused across grid steps).
        return pl.BlockSpec(shape, lambda i: (0,) * len(shape))

    kernel = functools.partial(_mlp_kernel, tile_b=tb, chunk_b=chunk_b)

    return pl.pallas_call(
        kernel,
        out_shape=jax.ShapeDtypeStruct((B, D_OUT), x.dtype),
        grid_spec=pltpu.PrefetchScalarGridSpec(
            num_scalar_prefetch=0,
            grid=grid,
            in_specs=[
                pl.BlockSpec((tb, D_IN), lambda i: (i, 0)),   # x tile
                full((D_IN, H1)), full((1, H1)),
                full((H1, H2)), full((1, H2)),
                full((H2, H3)), full((1, H3)),
                full((H3, D_OUT)), full((1, D_OUT)),
            ],
            out_specs=pl.BlockSpec((tb, D_OUT), lambda i: (i, 0)),
        ),
        compiler_params=pltpu.CompilerParams(
            dimension_semantics=("parallel",),
            vmem_limit_bytes=32 * 1024 * 1024,
        ),
    )(x, w1, b1, w2, b2, w3, b3, w4, b4)


def init_params(key):
    """Kaiming-normal (fan_in, relu => std = sqrt(2/fan_in)), zero biases."""
    dims = [(D_IN, H1), (H1, H2), (H2, H3), (H3, D_OUT)]
    params = []
    for fan_in, fan_out in dims:
        key, sub = jax.random.split(key)
        std = (2.0 / fan_in) ** 0.5
        w = std * jax.random.normal(sub, (fan_in, fan_out), dtype=jnp.float32)
        b = jnp.zeros((1, fan_out), dtype=jnp.float32)
        params += [w, b]
    return tuple(params)


def _reference_forward(x, params, mxu_dtype=jnp.float32):
    """Pure-JAX reference. With mxu_dtype=bf16 it mirrors the kernel's
    bf16-input / f32-accumulate matmuls exactly."""
    w1, b1, w2, b2, w3, b3, w4, b4 = params

    def lin(h, w, b):
        return jnp.dot(h.astype(mxu_dtype), w.astype(mxu_dtype),
                       preferred_element_type=jnp.float32) + b

    h = jnp.maximum(lin(x, w1, b1), 0.0)
    h = jnp.maximum(lin(h, w2, b2), 0.0)
    h = jnp.maximum(lin(h, w3, b3), 0.0)
    return lin(h, w4, b4)


if __name__ == "__main__":
    key = jax.random.PRNGKey(0)
    pkey, xkey1, xkey2 = jax.random.split(key, 3)
    params = init_params(pkey)

    # Small batch: single grid step, single in-kernel chunk.
    x_small = jax.random.normal(xkey1, (8, D_IN), dtype=jnp.float32)
    out_small = jax.block_until_ready(action_forward(x_small, params))
    assert out_small.shape == (8, D_OUT), out_small.shape
    ref_bf16 = _reference_forward(x_small, params, mxu_dtype=jnp.bfloat16)
    assert jnp.allclose(out_small, ref_bf16, atol=1e-3, rtol=1e-3), \
        "mismatch vs bf16-matched reference"
    ref_f32 = _reference_forward(x_small, params)
    assert jnp.allclose(out_small, ref_f32, atol=5e-2, rtol=5e-2), \
        "bf16 kernel drifted too far from f32 reference"

    # Larger batch: exercises the 2-step grid (both TCs on v7x), the unrolled
    # chunk loop (tb=512 > chunk_b=128 -> 4 chunks/step) and a ragged final
    # tile (88 valid rows in the last block).
    x_big = jax.random.normal(xkey2, (600, D_IN), dtype=jnp.float32)
    out_big = jax.block_until_ready(action_forward(x_big, params))
    assert out_big.shape == (600, D_OUT), out_big.shape
    ref_big = _reference_forward(x_big, params, mxu_dtype=jnp.bfloat16)
    assert jnp.allclose(out_big, ref_big, atol=1e-3, rtol=1e-3), \
        "mismatch vs bf16-matched reference (large batch)"

    # Pure-f32 MXU path: bit-faithful to the original module's f32 forward.
    out_f32 = jax.block_until_ready(
        action_forward(x_small, params, mxu_dtype=jnp.float32))
    assert jnp.allclose(out_f32, ref_f32, atol=1e-4, rtol=1e-4), \
        "f32 kernel mismatch vs f32 reference"

    print("KERNEL_OK")
</pallas_src>

<mosaic_0001>
module attributes {stable_mosaic.version = 11 : i64} {
  func.func @_mlp_kernel(%arg0: i32, %arg1: memref<8x16xf32, #tpu.memory_space<vmem>>, %arg2: memref<16x128xbf16, #tpu.memory_space<vmem>>, %arg3: memref<1x128xf32, #tpu.memory_space<vmem>>, %arg4: memref<128x64xbf16, #tpu.memory_space<vmem>>, %arg5: memref<1x64xf32, #tpu.memory_space<vmem>>, %arg6: memref<64x32xbf16, #tpu.memory_space<vmem>>, %arg7: memref<1x32xf32, #tpu.memory_space<vmem>>, %arg8: memref<32x16xbf16, #tpu.memory_space<vmem>>, %arg9: memref<1x16xf32, #tpu.memory_space<vmem>>, %arg10: memref<8x16xf32, #tpu.memory_space<vmem>>) attributes {dimension_semantics = [#tpu.dimension_semantics<parallel>], iteration_bounds = array<i64: 1>, scalar_prefetch = 0 : i64, scratch_operands = 0 : i64, tpu.core_type = #tpu.core_type<tc>, window_params = [{transform_indices = @transform_0, window_bounds = array<i64: 8, 16>}, {pipeline_mode = #tpu.pipeline_mode<synchronous>, transform_indices = @transform_1, window_bounds = array<i64: 16, 128>}, {pipeline_mode = #tpu.pipeline_mode<synchronous>, transform_indices = @transform_2, window_bounds = array<i64: 1, 128>}, {pipeline_mode = #tpu.pipeline_mode<synchronous>, transform_indices = @transform_3, window_bounds = array<i64: 128, 64>}, {pipeline_mode = #tpu.pipeline_mode<synchronous>, transform_indices = @transform_4, window_bounds = array<i64: 1, 64>}, {pipeline_mode = #tpu.pipeline_mode<synchronous>, transform_indices = @transform_5, window_bounds = array<i64: 64, 32>}, {pipeline_mode = #tpu.pipeline_mode<synchronous>, transform_indices = @transform_6, window_bounds = array<i64: 1, 32>}, {pipeline_mode = #tpu.pipeline_mode<synchronous>, transform_indices = @transform_7, window_bounds = array<i64: 32, 16>}, {pipeline_mode = #tpu.pipeline_mode<synchronous>, transform_indices = @transform_8, window_bounds = array<i64: 1, 16>}, {transform_indices = @transform_9, window_bounds = array<i64: 8, 16>}]} {
    %c0 = arith.constant 0 : index
    %c0_0 = arith.constant 0 : index
    %0 = vector.load %arg1[%c0, %c0_0] : memref<8x16xf32, #tpu.memory_space<vmem>>, vector<8x16xf32>
    %1 = arith.truncf %0 : vector<8x16xf32> to vector<8x16xbf16>
    %c0_1 = arith.constant 0 : index
    %c0_2 = arith.constant 0 : index
    %2 = vector.load %arg2[%c0_1, %c0_2] : memref<16x128xbf16, #tpu.memory_space<vmem>>, vector<16x128xbf16>
    %cst = arith.constant dense<0.000000e+00> : vector<8x128xf32>
    %3 = tpu.matmul %1, %2, %cst {dimension_numbers = #tpu.dot_dimension_numbers<[1], [0], [0], [1], [0, 0, 1, 1], [], []>} : vector<8x16xbf16>, vector<16x128xbf16>, vector<8x128xf32> -> vector<8x128xf32>
    %c0_3 = arith.constant 0 : index
    %c0_4 = arith.constant 0 : index
    %4 = vector.load %arg3[%c0_3, %c0_4] : memref<1x128xf32, #tpu.memory_space<vmem>>, vector<1x128xf32>
    %5 = vector.broadcast %4 : vector<1x128xf32> to vector<8x128xf32>
    %6 = arith.addf %3, %5 : vector<8x128xf32>
    %cst_5 = arith.constant 0.000000e+00 : f32
    %7 = vector.broadcast %cst_5 : f32 to vector<8x128xf32>
    %8 = arith.maximumf %6, %7 : vector<8x128xf32>
    %9 = arith.truncf %8 : vector<8x128xf32> to vector<8x128xbf16>
    %c0_6 = arith.constant 0 : index
    %c0_7 = arith.constant 0 : index
    %10 = vector.load %arg4[%c0_6, %c0_7] : memref<128x64xbf16, #tpu.memory_space<vmem>>, vector<128x64xbf16>
    %cst_8 = arith.constant dense<0.000000e+00> : vector<8x64xf32>
    %11 = tpu.matmul %9, %10, %cst_8 {dimension_numbers = #tpu.dot_dimension_numbers<[1], [0], [0], [1], [0, 0, 1, 1], [], []>} : vector<8x128xbf16>, vector<128x64xbf16>, vector<8x64xf32> -> vector<8x64xf32>
    %c0_9 = arith.constant 0 : index
    %c0_10 = arith.constant 0 : index
    %12 = vector.load %arg5[%c0_9, %c0_10] : memref<1x64xf32, #tpu.memory_space<vmem>>, vector<1x64xf32>
    %13 = vector.broadcast %12 : vector<1x64xf32> to vector<8x64xf32>
    %14 = arith.addf %11, %13 : vector<8x64xf32>
    %cst_11 = arith.constant 0.000000e+00 : f32
    %15 = vector.broadcast %cst_11 : f32 to vector<8x64xf32>
    %16 = arith.maximumf %14, %15 : vector<8x64xf32>
    %17 = arith.truncf %16 : vector<8x64xf32> to vector<8x64xbf16>
    %c0_12 = arith.constant 0 : index
    %c0_13 = arith.constant 0 : index
    %18 = vector.load %arg6[%c0_12, %c0_13] : memref<64x32xbf16, #tpu.memory_space<vmem>>, vector<64x32xbf16>
    %cst_14 = arith.constant dense<0.000000e+00> : vector<8x32xf32>
    %19 = tpu.matmul %17, %18, %cst_14 {dimension_numbers = #tpu.dot_dimension_numbers<[1], [0], [0], [1], [0, 0, 1, 1], [], []>} : vector<8x64xbf16>, vector<64x32xbf16>, vector<8x32xf32> -> vector<8x32xf32>
    %c0_15 = arith.constant 0 : index
    %c0_16 = arith.constant 0 : index
    %20 = vector.load %arg7[%c0_15, %c0_16] : memref<1x32xf32, #tpu.memory_space<vmem>>, vector<1x32xf32>
    %21 = vector.broadcast %20 : vector<1x32xf32> to vector<8x32xf32>
    %22 = arith.addf %19, %21 : vector<8x32xf32>
    %cst_17 = arith.constant 0.000000e+00 : f32
    %23 = vector.broadcast %cst_17 : f32 to vector<8x32xf32>
    %24 = arith.maximumf %22, %23 : vector<8x32xf32>
    %25 = arith.truncf %24 : vector<8x32xf32> to vector<8x32xbf16>
    %c0_18 = arith.constant 0 : index
    %c0_19 = arith.constant 0 : index
    %26 = vector.load %arg8[%c0_18, %c0_19] : memref<32x16xbf16, #tpu.memory_space<vmem>>, vector<32x16xbf16>
    %cst_20 = arith.constant dense<0.000000e+00> : vector<8x16xf32>
    %27 = tpu.matmul %25, %26, %cst_20 {dimension_numbers = #tpu.dot_dimension_numbers<[1], [0], [0], [1], [0, 0, 1, 1], [], []>} : vector<8x32xbf16>, vector<32x16xbf16>, vector<8x16xf32> -> vector<8x16xf32>
    %c0_21 = arith.constant 0 : index
    %c0_22 = arith.constant 0 : index
    %28 = vector.load %arg9[%c0_21, %c0_22] : memref<1x16xf32, #tpu.memory_space<vmem>>, vector<1x16xf32>
    %29 = vector.broadcast %28 : vector<1x16xf32> to vector<8x16xf32>
    %30 = arith.addf %27, %29 : vector<8x16xf32>
    %c0_23 = arith.constant 0 : index
    %c0_24 = arith.constant 0 : index
    %31 = vector.load %arg10[%c0_23, %c0_24] : memref<8x16xf32, #tpu.memory_space<vmem>>, vector<8x16xf32>
    tpu.vector_store %arg10[%c0_23, %c0_24], %30 {strides = array<i32>} : memref<8x16xf32, #tpu.memory_space<vmem>>, vector<8x16xf32>,
    return
  }
  func.func @transform_0(%arg0: i32) -> (i32, i32) {
    %c0_i32 = arith.constant 0 : i32
    %c0_i32_0 = arith.constant 0 : i32
    return %arg0, %c0_i32 : i32, i32
  }
  func.func @transform_1(%arg0: i32) -> (i32, i32) {
    %c0_i32 = arith.constant 0 : i32
    %c0_i32_0 = arith.constant 0 : i32
    %c0_i32_1 = arith.constant 0 : i32
    return %c0_i32, %c0_i32_0 : i32, i32
  }
  func.func @transform_2(%arg0: i32) -> (i32, i32) {
    %c0_i32 = arith.constant 0 : i32
    %c0_i32_0 = arith.constant 0 : i32
    %c0_i32_1 = arith.constant 0 : i32
    return %c0_i32, %c0_i32_0 : i32, i32
  }
  func.func @transform_3(%arg0: i32) -> (i32, i32) {
    %c0_i32 = arith.constant 0 : i32
    %c0_i32_0 = arith.constant 0 : i32
    %c0_i32_1 = arith.constant 0 : i32
    return %c0_i32, %c0_i32_0 : i32, i32
  }
  func.func @transform_4(%arg0: i32) -> (i32, i32) {
    %c0_i32 = arith.constant 0 : i32
    %c0_i32_0 = arith.constant 0 : i32
    %c0_i32_1 = arith.constant 0 : i32
    return %c0_i32, %c0_i32_0 : i32, i32
  }
  func.func @transform_5(%arg0: i32) -> (i32, i32) {
    %c0_i32 = arith.constant 0 : i32
    %c0_i32_0 = arith.constant 0 : i32
    %c0_i32_1 = arith.constant 0 : i32
    return %c0_i32, %c0_i32_0 : i32, i32
  }
  func.func @transform_6(%arg0: i32) -> (i32, i32) {
    %c0_i32 = arith.constant 0 : i32
    %c0_i32_0 = arith.constant 0 : i32
    %c0_i32_1 = arith.constant 0 : i32
    return %c0_i32, %c0_i32_0 : i32, i32
  }
  func.func @transform_7(%arg0: i32) -> (i32, i32) {
    %c0_i32 = arith.constant 0 : i32
    %c0_i32_0 = arith.constant 0 : i32
    %c0_i32_1 = arith.constant 0 : i32
    return %c0_i32, %c0_i32_0 : i32, i32
  }
  func.func @transform_8(%arg0: i32) -> (i32, i32) {
    %c0_i32 = arith.constant 0 : i32
    %c0_i32_0 = arith.constant 0 : i32
    %c0_i32_1 = arith.constant 0 : i32
    return %c0_i32, %c0_i32_0 : i32, i32
  }
  func.func @transform_9(%arg0: i32) -> (i32, i32) {
    %c0_i32 = arith.constant 0 : i32
    %c0_i32_0 = arith.constant 0 : i32
    return %arg0, %c0_i32 : i32, i32
  }
}

</mosaic_0001>

<bundles_post_ra>
// kernel: action_forward.1
= control target key start
LH: loop header
LB: loop body
LE: loop exit
PB: predicated region body
PF: predicated region fallthrough
CT: control target
= control target key end

     0   :  { %v506_v1 = vmov 0.0   ;;  %vm51_vm0 = vcmask 130048   ;;  %vm507_vm1 = vmmov 0   ;;  %s656_s0 = inlined_call_operand.vmem [shape: f32[8,16], index: 0, kind: input, shape index: {}]   ;;  %s657_s1 = inlined_call_operand.vmem [shape: bf16[16,128], index: 1, kind: input, shape index: {}]   ;;  %s658_s2 = inlined_call_operand.vmem [shape: f32[1,128], index: 2, kind: input, shape index: {}]   ;;  %s659_s3 = inlined_call_operand.vmem [shape: bf16[128,64], index: 3, kind: input, shape index: {}]   ;;  %s660_s4 = inlined_call_operand.vmem [shape: f32[1,64], index: 4, kind: input, shape index: {}]   ;;  %s661_s5 = inlined_call_operand.vmem [shape: bf16[64,32], index: 5, kind: input, shape index: {}]   ;;  %s662_s6 = inlined_call_operand.vmem [shape: f32[1,32], index: 6, kind: input, shape index: {}]   ;;  %s663_s7 = inlined_call_operand.vmem [shape: bf16[32,16], index: 7, kind: input, shape index: {}]   ;;  %s664_s8 = inlined_call_operand.vmem [shape: f32[1,16], index: 8, kind: input, shape index: {}]   ;;  %s665_s9 = inlined_call_operand.hbm [shape: f32[8,16], index: 9, kind: output, shape index: {}]  }
   0x1   :  { %v467_v0 = vld [vmem:[%s657_s1] sm:$0xff]   ;;  %418 = vmatprep.subr.bf16.mxu0 %v506_v1  ;;  %424 = vmatprep.subr.bf16.mxu1 %v506_v1  ;;  %v469_v5 = vld [vmem:[%s659_s3 + $0x8] sm:$0xff]   ;;  %v470_v6 = vld [vmem:[%s659_s3 + $0x10] sm:$0xff]  }
   0x2   :  { %v34_v2 = vld [vmem:[%s656_s0] sm:$0xff]  ;;  %419 = vmatpush3.bf16.msra.mxu0 %v467_v0  ;;  %420 = vmatprep.mubr.msk.bf16.mxu0 %vm507_vm1, %v506_v1  ;;  %v471_v7 = vld [vmem:[%s659_s3 + $0x18] sm:$0xff]  }
   0x3   :  { %v468_v3 = vld [vmem:[%s659_s3] sm:$0xff]   ;;  %v35_v4 = vpack.c.bf16 %v34_v2, %v34_v2  ;;  %440 = vmatprep.mubr.msk.bf16.mxu1 %vm507_vm1, %v506_v1  ;;  %444 = vmatprep.subr.bf16.mxu0 %v506_v1 }
   0x4   :  { %425 = vmatpush3.bf16.msra.mxu1 %v468_v3 }
   0x5   :  { %426 = vmatprep.subr.bf16.mxu1 %v506_v1  ;;  %421 = vmatmul.mubr.msk.bf16.vlgmr.msra.gmra.mrb[0].mxu0 %vm51_vm0, %v35_v4 }
   0x6   :  { %452 = vmatprep.mubr.msk.bf16.mxu0 %vm507_vm1, %v506_v1 }
   0x8   :  { %427 = vmatpush3.bf16.msra.mxu1 %v469_v5 }
   0x9   :  { %428 = vmatprep.subr.bf16.mxu1 %v506_v1 }
   0xc   :  { %429 = vmatpush3.bf16.msra.mxu1 %v470_v6 }
   0xd   :  { %430 = vmatprep.subr.bf16.mxu1 %v506_v1 }
   0xe   :  { %14 = vsyncpa [#allocation3], 0  ;;  %v472_v8 = vld [vmem:[%s659_s3 + $0x20] sm:$0xff]   ;;  %v473_v9 = vld [vmem:[%s659_s3 + $0x28] sm:$0xff]   ;;  %vm249_vm2 = vcmask 523264   ;;  %vm318_vm3 = vcmask 261120  }
   0xf   :  { %v474_v10 = vld [vmem:[%s659_s3 + $0x30] sm:$0xff]   ;;  %v475_v11 = vld [vmem:[%s659_s3 + $0x38] sm:$0xff]   ;;  %v476_v12 = vld [vmem:[%s661_s5] sm:$0xff]   ;;  %s508_s20 = smov [#allocation2]  }
  0x10   :  { %431 = vmatpush3.bf16.msra.mxu1 %v471_v7  ;;  %445 = vmatpush3.bf16.msra.mxu0 %v476_v12  ;;  %v477_v13 = vld [vmem:[%s661_s5 + $0x8] sm:$0xff]   ;;  %v377_v14 = vld [vmem:[%s658_s2] ss:$0 sm:$0xff]  ;;  %v478_v22 = vld [vmem:[%s661_s5 + $0x10] sm:$0xff]  }
  0x11   :  { %432 = vmatprep.subr.bf16.mxu1 %v506_v1  ;;  %446 = vmatprep.subr.bf16.mxu0 %v506_v1  ;;  %v479_v23 = vld [vmem:[%s661_s5 + $0x18] sm:$0xff]   ;;  %v380_v24 = vld [vmem:[%s660_s4] ss:$0 sm:$0xff]  ;;  %v481_v33 = vld [vmem:[%s663_s7 + $0x8] sm:$0xff]  }
  0x12   :  { %v480_v31 = vld [vmem:[%s663_s7] sm:$0xff]   ;;  %s369_s7 = sshll.u32 %s508_s20, 4  ;;  %s370_s7 = int_to_ptr.vmem [resolvable:$true] %s369_s7 }
  0x13   :  { %v389_v34 = vld [vmem:[%s662_s6] ss:$0 sm:$0xff]  ;;  %s482_s6 = scalar_lea.vmem %s370_s7, 128  ;;  %p487_p1 = scmp.lt.s32.totalorder %s370_s7, %s370_s7 }
  0x14   :  { %433 = vmatpush3.bf16.msra.mxu1 %v472_v8  ;;  %447 = vmatpush3.bf16.msra.mxu0 %v477_v13  ;;  %v395_v42 = vld [vmem:[%s664_s8] ss:$0 sm:$0xff]  ;;  %p483_p0 = scmp.ne.s32.totalorder %s370_s7, %s482_s6  ;;  %p488_p2 = scmp.lt.s32.totalorder %s482_s6, %s482_s6 }
  0x15   :  { %434 = vmatprep.subr.bf16.mxu1 %v506_v1  ;;  %448 = vmatprep.subr.bf16.mxu0 %v506_v1 }
  0x16   :  { %p489_p3 = por %p488_p2, %p487_p1 }
  0x18   :  { %435 = vmatpush3.bf16.msra.mxu1 %v473_v9  ;;  %449 = vmatpush3.bf16.msra.mxu0 %v478_v22  ;;  %p490_p4 = pnand %p489_p3, %p483_p0 }
  0x19   :  { %436 = vmatprep.subr.bf16.mxu1 %v506_v1  ;;  %450 = vmatprep.subr.bf16.mxu0 %v506_v1 }
  0x1c   :  { %437 = vmatpush3.bf16.msra.mxu1 %v474_v10  ;;  %451 = vmatpush3.bf16.msra.mxu0 %v479_v23 }
  0x1d   :  { %438 = vmatprep.subr.bf16.mxu1 %v506_v1  ;;  %456 = vmatprep.subr.bf16.mxu0 %v506_v1 }
  0x20   :  { %439 = vmatpush3.bf16.msra.mxu1 %v475_v11 }
  0xd8   :  { %v89_v15 = vpop.f32.mrb[0].mxu0 }
  0xd9   :  { %v90_v16 = vadd.f32 %v377_v14, %v89_v15  ;;  %v422_v17 = vpop.f32.mrb[1].mxu0 }
  0xda   :  { %v92_v18 = vpop.f32.mrb[2].mxu0 }
  0xdb   :  { %v95_v19 = vmax.f32 %v90_v16, 0.0  ;;  %v423_v20 = vpop.f32.mrb[3].mxu0 }
  0xdd   :  { %v96_v21 = vpack.c.bf16 %v95_v19, %v95_v19 }
  0xdf   :  { %441 = vmatmul.mubr.bf16.vlgmr.msra.gmra.mrb[0].mxu1 %v96_v21 }
 0x1b2   :  { %v202_v25 = vpop.f32.mrb[0].mxu1 }
 0x1b3   :  { %v203_v26 = vadd.f32 %v380_v24, %v202_v25  ;;  %v442_v27 = vpop.f32.mrb[1].mxu1 }
 0x1b4   :  { %v205_v28 = vpop.f32.mrb[2].mxu1 }
 0x1b5   :  { %v208_v29 = vmax.f32 %v203_v26, 0.0  ;;  %v443_v30 = vpop.f32.mrb[3].mxu1 }
 0x1b7   :  { %v209_v32 = vpack.c.bf16 %v208_v29, %v208_v29 }
 0x1b9   :  { %453 = vmatmul.mubr.msk.bf16.vlgmr.msra.gmra.mrb[4].mxu0 %vm249_vm2, %v209_v32 }
 0x1ba   :  { %457 = vmatpush3.bf16.msra.mxu0 %v480_v31  ;;  %460 = vmatprep.mubr.msk.bf16.mxu0 %vm507_vm1, %v506_v1 }
 0x1bb   :  { %458 = vmatprep.subr.bf16.mxu0 %v506_v1 }
 0x1be   :  { %459 = vmatpush3.bf16.msra.mxu0 %v481_v33 }
 0x28c   :  { %v287_v35 = vpop.f32.mrb[4].mxu0 }
 0x28d   :  { %v288_v36 = vadd.f32 %v389_v34, %v287_v35  ;;  %v454_v37 = vpop.f32.mrb[5].mxu0 }
 0x28e   :  { %v290_v38 = vpop.f32.mrb[6].mxu0 }
 0x28f   :  { %v293_v39 = vmax.f32 %v288_v36, 0.0  ;;  %v455_v40 = vpop.f32.mrb[7].mxu0 }
 0x291   :  { %v294_v41 = vpack.c.bf16 %v293_v39, %v293_v39 }
 0x293   :  { %461 = vmatmul.mubr.msk.bf16.vlgmr.msra.gmra.mrb[8].mxu0 %vm318_vm3, %v294_v41 }
 0x366   :  { %v356_v43 = vpop.f32.mrb[8].mxu0 }
 0x367   :  { %v357_v44 = vadd.f32 %v395_v42, %v356_v43  ;;  %v462_v45 = vpop.f32.mrb[9].mxu0 }
 0x368   :  { %v359_v46 = vpop.f32.mrb[10].mxu0 }
 0x369   :  { %362 = vst.msk [vmem:[#allocation2] sm:$0xff] %vm51_vm0, %v357_v44  ;;  %v463_v47 = vpop.f32.mrb[11].mxu0 }
 0x36a   :  { %493 = shalt.err (!%p490_p4)
}
 0x36b   :  { %s494_s8 = scalar_lea.hbm %s665_s9, 128 }
 0x36c   :  { %p495_p5 = scmp.ne.s32.totalorder %s665_s9, %s494_s8  ;;  %p498_p6 = scmp.lt.u32.totalorder %s494_s8, %s665_s9 }
 0x36e   :  { %p500_p7 = pnand %p498_p6, %p495_p5 }
 0x370   :  { %503 = shalt.err (!%p500_p7)
}
 0x371   :  { %372 = dma.vmem_to_hbm [thread:$0]  %s370_s7, 128, %s665_s9, [#allocation3]  }
 0x372   :  { %504 = dma.done.wait [#allocation3], 128  }
 0x373   :  { %505 = vsyncadd [#allocation3], 4294967168 }
 0x374   :  { %376 = vsyncpa [#allocation3], 1 }

</bundles_post_ra>
